<compile_context>
chip_gen: v7x
topology: tpu7x:2x2x1
jax: 0.10.0
libtpu: 0.0.40
codegen_flags: <defaults>
</compile_context>

<pallas_src>
import functools
import math

import jax
import jax.numpy as jnp
from jax import lax
from jax.experimental import pallas as pl
from jax.experimental.pallas import tpu as pltpu

_INV_SQRT2 = 0.7071067811865476
_HAS_STATEFUL_NORMAL = hasattr(pltpu, "stateful_normal")


# --------------------------------------------------------------------------
# In-kernel hardware PRNG helpers (only traced on the real-TPU path).
# --------------------------------------------------------------------------
def _bits_to_unit_float(bits):
    """uint32 random bits -> float32 uniform in [1.0, 2.0)."""
    bits = pltpu.bitcast(bits, jnp.uint32)
    return pltpu.bitcast((bits >> 9) | jnp.uint32(0x3F800000), jnp.float32)


def _unit_normal(shape):
    """Standard-normal float32 samples from the in-kernel hardware PRNG.

    Caller must have called pltpu.prng_seed() first.
    """
    if _HAS_STATEFUL_NORMAL:
        return pltpu.stateful_normal(shape, jnp.float32)
    # Fallback (older jax): Box-Muller keeping BOTH branches (cos and sin), so
    # only half the random bits and half the log/sqrt/trig EUP work per output.
    rows, cols = shape
    half = (cols + 1) // 2
    f1 = _bits_to_unit_float(pltpu.prng_random_bits((rows, half)))
    f2 = _bits_to_unit_float(pltpu.prng_random_bits((rows, half)))
    u1 = jnp.float32(2.0) - f1                    # (0, 1] -> log() finite
    u2 = f2 - jnp.float32(1.0)                    # [0, 1)
    r = jnp.sqrt(jnp.float32(-2.0) * jnp.log(u1))
    theta = jnp.float32(2.0 * math.pi) * u2
    n = jnp.concatenate([r * jnp.cos(theta), r * jnp.sin(theta)], axis=-1)
    return n[:, :cols]


# --------------------------------------------------------------------------
# Kernels
# --------------------------------------------------------------------------
def _store_and_normalize(o_ref, y, sqrt_l):
    """Stage y through the output block, then per-row RMS-normalize in place."""
    o_ref[...] = y
    # Per-batch-row sum of squares (re-read from VMEM; keeps vreg pressure flat
    # instead of holding a multi-MiB value live across the reduction).
    sumsq = jnp.sum(jnp.square(o_ref[...]), axis=-1, keepdims=True)
    # 1/rms = sqrt(L) * rsqrt(sum y^2): one EUP rsqrt per row + broadcast mul.
    # eps guards all-zero / garbage tail rows (those rows are masked on store).
    scale = lax.rsqrt(sumsq + jnp.float32(1e-30)) * jnp.float32(sqrt_l)
    o_ref[...] = o_ref[...] * scale


def _gn_kernel_hw_prng(seed_ref, snr_ref, x_ref, o_ref, *, sqrt_l, valid_cl):
    """One grid step = (TB, CLpad) rows; noise drawn by the hardware PRNG."""
    # Hash the block id into the seed so adjacent blocks get decorrelated
    # streams (int32 overflow wraps; benign for seeding).
    pltpu.prng_seed(seed_ref[0] ^ (pl.program_id(0) * jnp.int32(668265261)))
    snr = snr_ref[0]

    noise = _unit_normal(x_ref.shape)
    y = noise * jnp.float32(_INV_SQRT2) + x_ref[...] * snr
    if valid_cl < x_ref.shape[-1]:
        # Zero the lane-padding columns so they do not perturb the RMS.
        col = lax.broadcasted_iota(jnp.int32, x_ref.shape, x_ref.ndim - 1)
        y = jnp.where(col < valid_cl, y, jnp.float32(0.0))
    _store_and_normalize(o_ref, y, sqrt_l)


def _gn_kernel_host_noise(snr_ref, x_ref, n_ref, o_ref, *, sqrt_l):
    """Same math, noise streamed in from HBM (CPU/interpret-safe: jnp/lax only).

    x and noise are zero-padded in the wrapper, so pad columns give y == 0 and
    do not perturb the RMS.
    """
    snr = snr_ref[0]
    y = n_ref[...] * jnp.float32(_INV_SQRT2) + x_ref[...] * snr
    _store_and_normalize(o_ref, y, sqrt_l)


# --------------------------------------------------------------------------
# Wrapper
# --------------------------------------------------------------------------
def _pick_block_batch(batch, row_bytes):
    """(8,128)-aligned batch tile: ~2 MiB blocks, >= 2 grid steps when B >= 16."""
    target_block_bytes = 2 << 20
    tb = max(1, target_block_bytes // row_bytes)
    if batch >= 16:
        tb = min(tb, batch // 2)        # keep >= 2 blocks -> v7x's 2nd TensorCore
    if tb >= batch or batch <= 8:
        return batch                    # full dim -> always layout-legal
    return max(8, (tb // 8) * 8)        # sublane alignment; 8-row floor


def gaussian_noise_pallas(x, snr_scalar, key, *, block_batch=None, use_hw_prng=None):
    """x: (B, C, L) float32; snr_scalar: () linear SNR; key: jax PRNG key.

    Returns the RMS-normalized noisy signal, shape (B, C, L).
    """
    if use_hw_prng is None:
        # The TPU hardware PRNG primitives have no CPU / interpret lowering;
        # fall back to host-generated noise off-TPU so the kernel runs anywhere.
        use_hw_prng = jax.default_backend() == "tpu"

    B, C, L = x.shape
    CL = C * L
    # Lane-dense output stores: pad C*L up to a multiple of 128 (pad columns
    # are zero / masked and sliced off below).
    CL_pad = ((CL + 127) // 128) * 128

    # Flatten NCL -> (B, C*L): free for contiguous data; gives dense
    # (8,128)-aligned tiles instead of 2/8-sublane-utilized (1, 2, L) slabs.
    x2 = x.reshape(B, CL)
    if CL_pad != CL:
        x2 = jnp.pad(x2, ((0, 0), (0, CL_pad - CL)))

    row_bytes = CL_pad * x.dtype.itemsize
    tb = _pick_block_batch(B, row_bytes) if block_batch is None else block_batch
    num_blocks = pl.cdiv(B, tb)

    # VMEM budget: streamed arrays x 2 double buffers. Raise the scoped-VMEM
    # limit only when a long-L shape needs it (v5e default is 16 MiB).
    n_streams = 2 if use_hw_prng else 3
    vmem_needed = 2 * n_streams * tb * row_bytes + (1 << 20)
    compiler_kwargs = dict(dimension_semantics=("parallel",))
    if vmem_needed > (14 << 20):
        compiler_kwargs["vmem_limit_bytes"] = int(min(vmem_needed, 100 << 20))
    # TODO(synk): for extremely long signals (a single 8-row block beyond ~8 MiB)
    # add a second, "arbitrary" CL-split grid axis with a (tb,1) VMEM sumsq
    # accumulator instead of just raising vmem_limit_bytes.

    sqrt_l = math.sqrt(L)
    snr_arr = jnp.reshape(jnp.asarray(snr_scalar, dtype=jnp.float32), (1,))

    data_spec = pl.BlockSpec((tb, CL_pad), lambda i: (i, 0))
    smem_spec = pl.BlockSpec(memory_space=pltpu.MemorySpace.SMEM)
    cparams = pltpu.CompilerParams(**compiler_kwargs)
    out_shape = jax.ShapeDtypeStruct((B, CL_pad), x.dtype)

    if use_hw_prng:
        seed_arr = jax.random.randint(
            key, (1,), 0, jnp.iinfo(jnp.int32).max, dtype=jnp.int32
        )
        kernel = functools.partial(_gn_kernel_hw_prng, sqrt_l=sqrt_l, valid_cl=CL)
        out2 = pl.pallas_call(
            kernel,
            out_shape=out_shape,
            grid=(num_blocks,),
            in_specs=[smem_spec, smem_spec, data_spec],
            out_specs=data_spec,
            compiler_params=cparams,
        )(seed_arr, snr_arr, x2)
    else:
        noise = jax.random.normal(key, (B, CL), dtype=x.dtype)
        if CL_pad != CL:
            noise = jnp.pad(noise, ((0, 0), (0, CL_pad - CL)))
        kernel = functools.partial(_gn_kernel_host_noise, sqrt_l=sqrt_l)
        out2 = pl.pallas_call(
            kernel,
            out_shape=out_shape,
            grid=(num_blocks,),
            in_specs=[smem_spec, data_spec, data_spec],
            out_specs=data_spec,
            compiler_params=cparams,
        )(snr_arr, x2, noise)

    if CL_pad != CL:
        out2 = out2[:, :CL]
    return out2.reshape(B, C, L)


def gaussian_noise_forward(x, key, min_snr_db=-3.0, max_snr_db=20.0, training=True):
    """Forward of GaussianNoise. Returns (y_ncl, snr_db) in training, (x, None) in eval."""
    if not training:
        return x, None
    k_snr, k_noise = jax.random.split(key)
    snr_db = (
        jax.random.uniform(k_snr, (), dtype=jnp.float32)
        * (max_snr_db - min_snr_db)
        + min_snr_db
    )
    snr = jnp.float32(10.0) ** (snr_db / jnp.float32(10.0))
    y = gaussian_noise_pallas(x, snr, k_noise)
    return y, snr_db


if __name__ == "__main__":
    B, C, L = 8, 2, 128          # small NCL shapes (batch, I/Q, spatial)
    min_snr_db, max_snr_db = -3.0, 20.0

    key = jax.random.PRNGKey(0)
    k_x, k_fwd = jax.random.split(key)

    # Input should be RMS-normalized per the module's docstring.
    x_raw = jax.random.normal(k_x, (B, C, L), dtype=jnp.float32)
    rms_in = jnp.sqrt(jnp.sum(x_raw * x_raw, axis=(1, 2), keepdims=True)) / jnp.sqrt(
        jnp.float32(L)
    )
    x = x_raw / rms_in

    y, snr_db = gaussian_noise_forward(x, k_fwd, min_snr_db, max_snr_db)
    jax.block_until_ready(y)

    # --- checks -----------------------------------------------------------
    # Noise comes from a different stream than torch, so validate the
    # invariants of the op instead of bit-exact values.
    assert y.shape == (B, C, L) and y.dtype == jnp.float32
    assert bool(jnp.all(jnp.isfinite(y)))

    # Output must be RMS-normalized per batch element (exact by construction).
    rms_out = jnp.sqrt(jnp.sum(y * y, axis=(1, 2))) / jnp.sqrt(jnp.float32(L))
    assert jnp.allclose(rms_out, 1.0, atol=1e-3), rms_out

    # SNR draw lands in the configured range.
    assert min_snr_db - 1e-5 <= float(snr_db) <= max_snr_db + 1e-5

    # Noise was actually injected: output differs from the noise-free
    # RMS-normalized scaled signal.
    snr_lin = 10.0 ** (float(snr_db) / 10.0)
    sig = x * snr_lin
    sig_rms = jnp.sqrt(jnp.sum(sig * sig, axis=(1, 2), keepdims=True)) / jnp.sqrt(
        jnp.float32(L)
    )
    assert not jnp.allclose(y, sig / sig_rms, atol=1e-3)

    # Eval-mode passthrough.
    y_eval, snr_eval = gaussian_noise_forward(x, k_fwd, training=False)
    assert snr_eval is None and jnp.allclose(y_eval, x)

    print("KERNEL_OK")
</pallas_src>

<mosaic_0001>
module attributes {stable_mosaic.version = 11 : i64} {
  func.func @_gn_kernel_host_noise(%arg0: i32, %arg1: memref<1xf32, #tpu.memory_space<smem>>, %arg2: memref<8x256xf32, #tpu.memory_space<vmem>>, %arg3: memref<8x256xf32, #tpu.memory_space<vmem>>, %arg4: memref<8x256xf32, #tpu.memory_space<vmem>>) attributes {dimension_semantics = [#tpu.dimension_semantics<parallel>], iteration_bounds = array<i64: 1>, scalar_prefetch = 0 : i64, scratch_operands = 0 : i64, tpu.core_type = #tpu.core_type<tc>, window_params = [{transform_indices = @transform_0, window_bounds = array<i64: 1>}, {transform_indices = @transform_1, window_bounds = array<i64: 8, 256>}, {transform_indices = @transform_2, window_bounds = array<i64: 8, 256>}, {transform_indices = @transform_3, window_bounds = array<i64: 8, 256>}]} {
    %c0 = arith.constant 0 : index
    %0 = memref.load %arg1[%c0] : memref<1xf32, #tpu.memory_space<smem>>
    %c0_0 = arith.constant 0 : index
    %c0_1 = arith.constant 0 : index
    %1 = vector.load %arg3[%c0_0, %c0_1] : memref<8x256xf32, #tpu.memory_space<vmem>>, vector<8x256xf32>
    %cst = arith.constant 0.707106769 : f32
    %2 = vector.broadcast %cst : f32 to vector<8x256xf32>
    %3 = arith.mulf %1, %2 : vector<8x256xf32>
    %c0_2 = arith.constant 0 : index
    %c0_3 = arith.constant 0 : index
    %4 = vector.load %arg2[%c0_2, %c0_3] : memref<8x256xf32, #tpu.memory_space<vmem>>, vector<8x256xf32>
    %5 = vector.broadcast %0 : f32 to vector<8x256xf32>
    %6 = arith.mulf %4, %5 : vector<8x256xf32>
    %7 = arith.addf %3, %6 : vector<8x256xf32>
    %c0_4 = arith.constant 0 : index
    %c0_5 = arith.constant 0 : index
    %8 = vector.load %arg4[%c0_4, %c0_5] : memref<8x256xf32, #tpu.memory_space<vmem>>, vector<8x256xf32>
    tpu.vector_store %arg4[%c0_4, %c0_5], %7 {strides = array<i32>} : memref<8x256xf32, #tpu.memory_space<vmem>>, vector<8x256xf32>,
    %c0_6 = arith.constant 0 : index
    %c0_7 = arith.constant 0 : index
    %9 = vector.load %arg4[%c0_6, %c0_7] : memref<8x256xf32, #tpu.memory_space<vmem>>, vector<8x256xf32>
    %10 = arith.mulf %9, %9 : vector<8x256xf32>
    %cst_8 = arith.constant dense<0.000000e+00> : vector<8xf32>
    %11 = vector.multi_reduction <add>, %10, %cst_8 [1] : vector<8x256xf32> to vector<8xf32>
    %12 = vector.shape_cast %11 : vector<8xf32> to vector<8x1xf32>
    %cst_9 = arith.constant 1.000000e-30 : f32
    %13 = vector.broadcast %cst_9 : f32 to vector<8x1xf32>
    %14 = arith.addf %12, %13 : vector<8x1xf32>
    %15 = math.rsqrt %14 : vector<8x1xf32>
    %cst_10 = arith.constant 11.3137083 : f32
    %16 = vector.broadcast %cst_10 : f32 to vector<8x1xf32>
    %17 = arith.mulf %15, %16 : vector<8x1xf32>
    %c0_11 = arith.constant 0 : index
    %c0_12 = arith.constant 0 : index
    %18 = vector.load %arg4[%c0_11, %c0_12] : memref<8x256xf32, #tpu.memory_space<vmem>>, vector<8x256xf32>
    %19 = vector.broadcast %17 : vector<8x1xf32> to vector<8x256xf32>
    %20 = arith.mulf %18, %19 : vector<8x256xf32>
    %c0_13 = arith.constant 0 : index
    %c0_14 = arith.constant 0 : index
    %21 = vector.load %arg4[%c0_13, %c0_14] : memref<8x256xf32, #tpu.memory_space<vmem>>, vector<8x256xf32>
    tpu.vector_store %arg4[%c0_13, %c0_14], %20 {strides = array<i32>} : memref<8x256xf32, #tpu.memory_space<vmem>>, vector<8x256xf32>,
    return
  }
  func.func @transform_0(%arg0: i32) -> i32 {
    %c0_i32 = arith.constant 0 : i32
    %c0_i32_0 = arith.constant 0 : i32
    return %c0_i32 : i32
  }
  func.func @transform_1(%arg0: i32) -> (i32, i32) {
    %c0_i32 = arith.constant 0 : i32
    %c0_i32_0 = arith.constant 0 : i32
    return %arg0, %c0_i32 : i32, i32
  }
  func.func @transform_2(%arg0: i32) -> (i32, i32) {
    %c0_i32 = arith.constant 0 : i32
    %c0_i32_0 = arith.constant 0 : i32
    return %arg0, %c0_i32 : i32, i32
  }
  func.func @transform_3(%arg0: i32) -> (i32, i32) {
    %c0_i32 = arith.constant 0 : i32
    %c0_i32_0 = arith.constant 0 : i32
    return %arg0, %c0_i32 : i32, i32
  }
}

</mosaic_0001>

<bundles_post_ra>
// kernel: tpu_custom_call.1
= control target key start
LH: loop header
LB: loop body
LE: loop exit
PB: predicated region body
PF: predicated region fallthrough
CT: control target
= control target key end

     0   :  { %9 = vsyncpa [#allocation4], 0  ;;  %s223_s0 = inlined_call_operand.<no memory space> [shape: f32[1], index: 0, kind: input, shape index: {}]   ;;  %s224_s1 = inlined_call_operand.hbm [shape: f32[8,256], index: 1, kind: input, shape index: {}]   ;;  %s225_s2 = inlined_call_operand.hbm [shape: f32[8,256], index: 2, kind: input, shape index: {}]   ;;  %s226_s3 = inlined_call_operand.hbm [shape: f32[8,256], index: 3, kind: output, shape index: {}]  }
   0x1   :  { %10 = vsyncpa [#allocation7], 0 }
   0x2   :  { %11 = vsyncpa [#allocation5], 0  ;;  %s161_s12 = smov [#allocation3]   ;;  %s162_s14 = smov [#allocation6]  }
   0x3   :  { %s20_s13 = sshll.u32 %s161_s12, 4  ;;  %s30_s15 = sshll.u32 %s162_s14, 4  ;;  %s21_s13 = int_to_ptr.vmem [resolvable:$true] %s20_s13  ;;  %s31_s15 = int_to_ptr.vmem [resolvable:$true] %s30_s15 }
   0x4   :  { %s89_s18 = scalar_lea.hbm %s224_s1, 256 }
   0x5   :  { %p90_p0 = scmp.ne.s32.totalorder %s224_s1, %s89_s18  ;;  %p93_p1 = scmp.lt.u32.totalorder %s89_s18, %s224_s1 }
   0x7   :  { %p95_p2 = pnand %p93_p1, %p90_p0 }
   0x9   :  { %98 = shalt.err (!%p95_p2)
}
   0xa   :  { %s99_s23 = scalar_lea.vmem %s21_s13, 256  ;;  %p104_p4 = scmp.lt.s32.totalorder %s21_s13, %s21_s13 }
   0xb   :  { %p100_p3 = scmp.ne.s32.totalorder %s21_s13, %s99_s23  ;;  %p105_p5 = scmp.lt.s32.totalorder %s99_s23, %s99_s23 }
   0xd   :  { %p106_p6 = por %p105_p5, %p104_p4 }
   0xf   :  { %p107_p7 = pnand %p106_p6, %p100_p3 }
  0x11   :  { %110 = shalt.err (!%p107_p7)
}
  0x12   :  { %23 = dma.hbm_to_vmem [thread:$0]  %s224_s1, 256, %s21_s13, [#allocation4]  }
  0x13   :  { %s111_s28 = scalar_lea.hbm %s225_s2, 256 }
  0x14   :  { %p112_p8 = scmp.ne.s32.totalorder %s225_s2, %s111_s28  ;;  %p115_p9 = scmp.lt.u32.totalorder %s111_s28, %s225_s2 }
  0x16   :  { %p117_p10 = pnand %p115_p9, %p112_p8 }
  0x18   :  { %120 = shalt.err (!%p117_p10)
}
  0x19   :  { %s121_s6 = scalar_lea.vmem %s31_s15, 256  ;;  %p126_p12 = scmp.lt.s32.totalorder %s31_s15, %s31_s15 }
  0x1a   :  { %p122_p11 = scmp.ne.s32.totalorder %s31_s15, %s121_s6  ;;  %p127_p13 = scmp.lt.s32.totalorder %s121_s6, %s121_s6 }
  0x1c   :  { %p128_p0 = por %p127_p13, %p126_p12 }
  0x1e   :  { %p129_p1 = pnand %p128_p0, %p122_p11 }
  0x20   :  { %132 = shalt.err (!%p129_p1)
}
  0x21   :  { %33 = dma.hbm_to_vmem [thread:$0]  %s225_s2, 256, %s31_s15, [#allocation7]  }
  0x22   :  { %155 = dma.done.wait [#allocation4], 256  }
  0x23   :  { %156 = vsyncadd [#allocation4], 4294967040 }
  0x24   :  { %157 = dma.done.wait [#allocation7], 256  }
  0x25   :  { %158 = vsyncadd [#allocation7], 4294967040  ;;  %v47_v0 = vstv %s223_s0  ;;  %v41_v1 = vld [vmem:[#allocation6] sm:$0xff]  ;;  %v42_v2 = vld [vmem:[#allocation6 + $0x8] sm:$0xff]  ;;  %s163_s2 = smov [#allocation8]  }
  0x26   :  { %v45_v3 = vld [vmem:[#allocation3] sm:$0xff]  ;;  %v43_v4 = vmul.f32 0.70710677, %v41_v1  ;;  %v44_v5 = vmul.f32 0.70710677, %v42_v2  ;;  %v46_v6 = vld [vmem:[#allocation3 + $0x8] sm:$0xff] }
  0x27   :  { %v48_v7 = vmul.f32 %v47_v0, %v45_v3  ;;  %v49_v8 = vmul.f32 %v47_v0, %v46_v6  ;;  %s74_s0 = sshll.u32 %s163_s2, 4  ;;  %s75_s0 = int_to_ptr.vmem [resolvable:$true] %s74_s0 }
  0x28   :  { %s133_s10 = scalar_lea.vmem %s75_s0, 256  ;;  %p138_p3 = scmp.lt.s32.totalorder %s75_s0, %s75_s0 }
  0x29   :  { %v50_v9 = vadd.f32 %v48_v7, %v43_v4  ;;  %v51_v10 = vadd.f32 %v49_v8, %v44_v5  ;;  %p134_p2 = scmp.ne.s32.totalorder %s75_s0, %s133_s10  ;;  %p139_p4 = scmp.lt.s32.totalorder %s133_s10, %s133_s10 }
  0x2b   :  { %v56_v11 = vmul.f32 %v50_v9, %v50_v9  ;;  %v57_v12 = vmul.f32 %v51_v10, %v51_v10  ;;  %p140_p5 = por %p139_p4, %p138_p3 }
  0x2d   :  { %v58_v13 = vadd.f32 %v57_v12, %v56_v11  ;;  %p141_p6 = pnand %p140_p5, %p134_p2 }
  0x2f   :  { %59 = vadd.xlane.f32.xlu0 %v58_v13 }
  0xbc   :  { %v60_v14 = vpop.xlane.xlu0 %59 }
  0xbd   :  { %v61_v15 = vadd.f32 1e-30, %v60_v14 }
  0xbf   :  { %87 = vrsqrt.f32 %v61_v15 }
  0xc9   :  { %v88_v16 = vpop.eup %87 }
  0xca   :  { %v63_v17 = vmul.f32 11.313708, %v88_v16 }
  0xcc   :  { %v64_v18 = vmul.f32 %v63_v17, %v50_v9  ;;  %v65_v19 = vmul.f32 %v63_v17, %v51_v10 }
  0xce   :  { %66 = vst [vmem:[#allocation8] sm:$0xff] %v64_v18  ;;  %67 = vst [vmem:[#allocation8 + $0x8] sm:$0xff] %v65_v19 }
  0xcf   :  { %144 = shalt.err (!%p141_p6)
}
  0xd0   :  { %s145_s13 = scalar_lea.hbm %s226_s3, 256 }
  0xd1   :  { %p146_p7 = scmp.ne.s32.totalorder %s226_s3, %s145_s13  ;;  %p149_p8 = scmp.lt.u32.totalorder %s145_s13, %s226_s3 }
  0xd3   :  { %p151_p9 = pnand %p149_p8, %p146_p7 }
  0xd5   :  { %154 = shalt.err (!%p151_p9)
}
  0xd6   :  { %77 = dma.vmem_to_hbm [thread:$0]  %s75_s0, 256, %s226_s3, [#allocation5]  }
  0xd7   :  { %159 = dma.done.wait [#allocation5], 256  }
  0xd8   :  { %160 = vsyncadd [#allocation5], 4294967040 }
  0xd9   :  { %81 = vsyncpa [#allocation4], 1 }
  0xda   :  { %82 = vsyncpa [#allocation7], 1 }
  0xdb   :  { %83 = vsyncpa [#allocation5], 1 }

</bundles_post_ra>
